<compile_context>
chip_gen: v5e
topology: v5e:2x2
jax: 0.10.0
libtpu: 0.0.40
codegen_flags: <defaults>
</compile_context>

<pallas_src>
import math

import jax
import jax.numpy as jnp
from jax.experimental import pallas as pl
from jax.experimental.pallas import tpu as pltpu

# ----------------------------- configuration ------------------------------
B = 2         # batch
S = 8         # sequence length
D = 32        # d_model
H = 4         # number of attention heads
DK = D // H   # per-head dim
DFF = 64      # feed-forward hidden dim
LN_EPS = 1e-5
N = B * S     # folded row count
LANES = 128   # slab lane width

# ------------------- packed parameter slab row offsets --------------------
_WQ0 = 0            # (D, D)   Q weight, pre-scaled by 1/sqrt(dk)
_WK0 = _WQ0 + D     # (D, D)   K weight
_WV0 = _WK0 + D     # (D, D)   V weight
_WO0 = _WV0 + D     # (D, D)   output-projection weight
_W10 = _WO0 + D     # (D, DFF) FF first weight
_W20 = _W10 + D     # (DFF, D) FF second weight
_VEC0 = _W20 + DFF  # 8 rows: bq*inv, bk, bv, bo, b1, b2, gamma, beta
SLAB_ROWS = _VEC0 + 8          # 232 rows (multiple of 8)


# ------------------------------- kernel -----------------------------------
def _transformer_layer_kernel(x_ref, amask_ref, slab_ref, out_ref):
    x = x_ref[...].astype(jnp.float32)     # (N, D)
    amask = amask_ref[...]                 # (N, N) additive f32 mask

    # ---- static slices of the packed parameter slab ----
    wq = slab_ref[_WQ0:_WQ0 + D, 0:D]      # already scaled by 1/sqrt(dk)
    wk = slab_ref[_WK0:_WK0 + D, 0:D]
    wv = slab_ref[_WV0:_WV0 + D, 0:D]
    wo = slab_ref[_WO0:_WO0 + D, 0:D]
    w1 = slab_ref[_W10:_W10 + D, 0:DFF]
    w2 = slab_ref[_W20:_W20 + DFF, 0:D]
    vec = slab_ref[_VEC0:_VEC0 + 8, :]     # (8, 128)
    bq = vec[0:1, 0:D]                     # already scaled by 1/sqrt(dk)
    bk = vec[1:2, 0:D]
    bv = vec[2:3, 0:D]
    bo = vec[3:4, 0:D]
    b1 = vec[4:5, 0:DFF]
    b2 = vec[5:6, 0:D]
    gamma = vec[6:7, 0:D]
    beta = vec[7:8, 0:D]

    def layernorm(v):
        mu = jnp.mean(v, axis=-1, keepdims=True)
        c = v - mu
        var = jnp.mean(c * c, axis=-1, keepdims=True)
        return c * jax.lax.rsqrt(var + LN_EPS) * gamma + beta

    # ---- sublayer 1: z = LN(x); multi-head self-attention ----
    z = layernorm(x)
    q = jnp.dot(z, wq, preferred_element_type=jnp.float32) + bq   # pre-scaled
    k = jnp.dot(z, wk, preferred_element_type=jnp.float32) + bk
    v = jnp.dot(z, wv, preferred_element_type=jnp.float32) + bv
    kt = k.T                               # single transpose (D, N), shared by all heads

    attn = jnp.broadcast_to(bo, x.shape)   # start from output-projection bias
    for h in range(H):                     # short, fully unrolled
        lo = h * DK
        s = jnp.dot(q[:, lo:lo + DK], kt[lo:lo + DK, :],
                    preferred_element_type=jnp.float32) + amask   # (N, N)
        m = jnp.max(s, axis=-1, keepdims=True)
        p = jnp.exp(s - m)
        p = p / jnp.sum(p, axis=-1, keepdims=True)                # exact softmax
        ctx = jnp.dot(p, v[:, lo:lo + DK],
                      preferred_element_type=jnp.float32)         # (N, DK)
        attn = attn + jnp.dot(ctx, wo[lo:lo + DK, :],
                              preferred_element_type=jnp.float32)

    x1 = x + attn            # residual 1 (dropout is identity in eval mode)

    # ---- sublayer 2: z = LN(x1); feed-forward; residual adds to z (module) ----
    z2 = layernorm(x1)
    h1 = jnp.maximum(jnp.dot(z2, w1, preferred_element_type=jnp.float32) + b1, 0.0)
    ff = jnp.dot(h1, w2, preferred_element_type=jnp.float32) + b2
    x2 = z2 + ff

    # ---- final LN ----
    out_ref[...] = layernorm(x2).astype(out_ref.dtype)


# ----------------------- one-time preprocessing helpers --------------------
def pack_params(params):
    """Pack all weights/biases into one (SLAB_ROWS, 128) f32 slab.

    1/sqrt(dk) is folded into the Q projection weight and bias.
    """
    inv_sqrt_dk = 1.0 / math.sqrt(DK)

    def pad(a):
        a = a.astype(jnp.float32)
        return jnp.pad(a, ((0, 0), (0, LANES - a.shape[1])))

    vec_rows = jnp.concatenate([
        pad(params["bq"] * inv_sqrt_dk),
        pad(params["bk"]),
        pad(params["bv"]),
        pad(params["bo"]),
        pad(params["b1"]),
        pad(params["b2"]),
        pad(params["gamma"]),
        pad(params["beta"]),
    ], axis=0)
    slab = jnp.concatenate([
        pad(params["wq"] * inv_sqrt_dk),
        pad(params["wk"]),
        pad(params["wv"]),
        pad(params["wo"]),
        pad(params["w1"]),
        pad(params["w2"]),
        vec_rows,
    ], axis=0)
    assert slab.shape == (SLAB_ROWS, LANES)
    return slab


def build_additive_mask(mask):
    """Fold a (B, S, S) {0,1} mask into an additive (B*S, B*S) f32 mask.

    0 where attention is allowed (same batch AND mask != 0), -1e9 otherwise.
    Cross-batch entries are blocked so the folded softmax equals the per-batch
    softmax exactly (blocked entries underflow to exactly 0).  Built once,
    outside the per-call path.
    """
    r = jnp.arange(N)
    bi, si = r // S, r % S
    vals = mask[bi[:, None], si[:, None], si[None, :]]
    ok = (bi[:, None] == bi[None, :]) & (vals != 0)
    return jnp.where(ok, 0.0, -1e9).astype(jnp.float32)


# ------------------------------- wrapper -----------------------------------
def transformer_layer(x, amask, slab):
    b, s, d = x.shape
    n = b * s
    xf = x.reshape(n, d)                   # fold batch into the sublane axis

    full = lambda a: pl.BlockSpec(a.shape, lambda i: (0,) * a.ndim)
    args = (xf, amask, slab)               # only 3 input arrays / DMAs

    out = pl.pallas_call(
        _transformer_layer_kernel,
        out_shape=jax.ShapeDtypeStruct((n, d), x.dtype),
        grid=(1,),
        in_specs=[full(a) for a in args],
        out_specs=pl.BlockSpec((n, d), lambda i: (0, 0)),
        compiler_params=pltpu.CompilerParams(
            dimension_semantics=("arbitrary",)),
    )(*args)
    return out.reshape(b, s, d)


# ---------------------------- pure-JAX reference ----------------------------
def _reference(x, mask, p):
    hi = jax.lax.Precision.HIGHEST
    mm = lambda a, b: jnp.matmul(a, b, precision=hi)

    def ln(v):
        mu = jnp.mean(v, axis=-1, keepdims=True)
        var = jnp.mean((v - mu) ** 2, axis=-1, keepdims=True)
        return (v - mu) / jnp.sqrt(var + LN_EPS) * p["gamma"][0] + p["beta"][0]

    z = ln(x)
    q = mm(z, p["wq"]) + p["bq"][0]
    k = mm(z, p["wk"]) + p["bk"][0]
    v = mm(z, p["wv"]) + p["bv"][0]
    qh = q.reshape(B, S, H, DK)
    kh = k.reshape(B, S, H, DK)
    vh = v.reshape(B, S, H, DK)
    sc = jnp.einsum('bqhd,bkhd->bhqk', qh, kh, precision=hi) / math.sqrt(DK)
    sc = jnp.where(mask[:, None] == 0, -1e9, sc)
    pr = jax.nn.softmax(sc, axis=-1)
    ctx = jnp.einsum('bhqk,bkhd->bqhd', pr, vh, precision=hi).reshape(B, S, D)
    attn = mm(ctx, p["wo"]) + p["bo"][0]
    x1 = x + attn
    z2 = ln(x1)
    ff = mm(jnp.maximum(mm(z2, p["w1"]) + p["b1"][0], 0.0), p["w2"]) + p["b2"][0]
    return ln(z2 + ff)


# ---------------------------------- main ------------------------------------
if __name__ == "__main__":
    key = jax.random.PRNGKey(0)
    keys = jax.random.split(key, 14)

    scale = 0.02
    params = {
        "wq": scale * jax.random.normal(keys[0], (D, D), jnp.float32),
        "bq": scale * jax.random.normal(keys[1], (1, D), jnp.float32),
        "wk": scale * jax.random.normal(keys[2], (D, D), jnp.float32),
        "bk": scale * jax.random.normal(keys[3], (1, D), jnp.float32),
        "wv": scale * jax.random.normal(keys[4], (D, D), jnp.float32),
        "bv": scale * jax.random.normal(keys[5], (1, D), jnp.float32),
        "wo": scale * jax.random.normal(keys[6], (D, D), jnp.float32),
        "bo": scale * jax.random.normal(keys[7], (1, D), jnp.float32),
        "w1": scale * jax.random.normal(keys[8], (D, DFF), jnp.float32),
        "b1": scale * jax.random.normal(keys[9], (1, DFF), jnp.float32),
        "w2": scale * jax.random.normal(keys[10], (DFF, D), jnp.float32),
        "b2": scale * jax.random.normal(keys[11], (1, D), jnp.float32),
        "gamma": 1.0 + 0.1 * jax.random.normal(keys[12], (1, D), jnp.float32),
        "beta": 0.1 * jax.random.normal(keys[13], (1, D), jnp.float32),
    }

    x = jax.random.normal(jax.random.PRNGKey(42), (B, S, D), jnp.float32)
    # causal mask, 0 = blocked
    mask = jnp.tril(jnp.ones((S, S), jnp.int32))[None].repeat(B, axis=0)

    # One-time preprocessing (outside the per-call path).
    slab = pack_params(params)
    amask = build_additive_mask(mask)

    out = transformer_layer(x, amask, slab)
    out = jax.block_until_ready(out)

    ref = _reference(x, mask, params)
    assert jnp.allclose(out, ref, atol=1e-4, rtol=1e-4), "mismatch vs reference"

    print("KERNEL_OK")
</pallas_src>

<mosaic_0001>
module attributes {stable_mosaic.version = 11 : i64} {
  func.func @_transformer_layer_kernel(%arg0: i32, %arg1: memref<16x32xf32, #tpu.memory_space<vmem>>, %arg2: memref<16x16xf32, #tpu.memory_space<vmem>>, %arg3: memref<232x128xf32, #tpu.memory_space<vmem>>, %arg4: memref<16x32xf32, #tpu.memory_space<vmem>>) attributes {dimension_semantics = [#tpu.dimension_semantics<arbitrary>], iteration_bounds = array<i64: 1>, scalar_prefetch = 0 : i64, scratch_operands = 0 : i64, tpu.core_type = #tpu.core_type<tc>, window_params = [{pipeline_mode = #tpu.pipeline_mode<synchronous>, transform_indices = @transform_0, window_bounds = array<i64: 16, 32>}, {pipeline_mode = #tpu.pipeline_mode<synchronous>, transform_indices = @transform_1, window_bounds = array<i64: 16, 16>}, {pipeline_mode = #tpu.pipeline_mode<synchronous>, transform_indices = @transform_2, window_bounds = array<i64: 232, 128>}, {pipeline_mode = #tpu.pipeline_mode<synchronous>, transform_indices = @transform_3, window_bounds = array<i64: 16, 32>}]} {
    %c0 = arith.constant 0 : index
    %c0_0 = arith.constant 0 : index
    %0 = vector.load %arg1[%c0, %c0_0] : memref<16x32xf32, #tpu.memory_space<vmem>>, vector<16x32xf32>
    %c0_1 = arith.constant 0 : index
    %c0_2 = arith.constant 0 : index
    %1 = vector.load %arg2[%c0_1, %c0_2] : memref<16x16xf32, #tpu.memory_space<vmem>>, vector<16x16xf32>
    %c0_3 = arith.constant 0 : index
    %c0_4 = arith.constant 0 : index
    %2 = vector.load %arg3[%c0_3, %c0_4] : memref<232x128xf32, #tpu.memory_space<vmem>>, vector<32x32xf32>
    %c32 = arith.constant 32 : index
    %c0_5 = arith.constant 0 : index
    %3 = vector.load %arg3[%c32, %c0_5] : memref<232x128xf32, #tpu.memory_space<vmem>>, vector<32x32xf32>
    %c64 = arith.constant 64 : index
    %c0_6 = arith.constant 0 : index
    %4 = vector.load %arg3[%c64, %c0_6] : memref<232x128xf32, #tpu.memory_space<vmem>>, vector<32x32xf32>
    %c96 = arith.constant 96 : index
    %c0_7 = arith.constant 0 : index
    %5 = vector.load %arg3[%c96, %c0_7] : memref<232x128xf32, #tpu.memory_space<vmem>>, vector<32x32xf32>
    %c128 = arith.constant 128 : index
    %c0_8 = arith.constant 0 : index
    %6 = vector.load %arg3[%c128, %c0_8] : memref<232x128xf32, #tpu.memory_space<vmem>>, vector<32x64xf32>
    %c160 = arith.constant 160 : index
    %c0_9 = arith.constant 0 : index
    %7 = vector.load %arg3[%c160, %c0_9] : memref<232x128xf32, #tpu.memory_space<vmem>>, vector<64x32xf32>
    %c224 = arith.constant 224 : index
    %c0_10 = arith.constant 0 : index
    %8 = vector.load %arg3[%c224, %c0_10] : memref<232x128xf32, #tpu.memory_space<vmem>>, vector<8x128xf32>
    %9 = vector.extract_strided_slice %8 {offsets = [0, 0], sizes = [1, 32], strides = [1, 1]} : vector<8x128xf32> to vector<1x32xf32>
    %10 = vector.extract_strided_slice %8 {offsets = [1, 0], sizes = [1, 32], strides = [1, 1]} : vector<8x128xf32> to vector<1x32xf32>
    %11 = vector.extract_strided_slice %8 {offsets = [2, 0], sizes = [1, 32], strides = [1, 1]} : vector<8x128xf32> to vector<1x32xf32>
    %12 = vector.extract_strided_slice %8 {offsets = [3, 0], sizes = [1, 32], strides = [1, 1]} : vector<8x128xf32> to vector<1x32xf32>
    %13 = vector.extract_strided_slice %8 {offsets = [4, 0], sizes = [1, 64], strides = [1, 1]} : vector<8x128xf32> to vector<1x64xf32>
    %14 = vector.extract_strided_slice %8 {offsets = [5, 0], sizes = [1, 32], strides = [1, 1]} : vector<8x128xf32> to vector<1x32xf32>
    %15 = vector.extract_strided_slice %8 {offsets = [6, 0], sizes = [1, 32], strides = [1, 1]} : vector<8x128xf32> to vector<1x32xf32>
    %16 = vector.extract_strided_slice %8 {offsets = [7, 0], sizes = [1, 32], strides = [1, 1]} : vector<8x128xf32> to vector<1x32xf32>
    %cst = arith.constant dense<0.000000e+00> : vector<16xf32>
    %17 = vector.multi_reduction <add>, %0, %cst [1] : vector<16x32xf32> to vector<16xf32>
    %18 = vector.shape_cast %17 : vector<16xf32> to vector<16x1xf32>
    %cst_11 = arith.constant 3.200000e+01 : f32
    %19 = vector.broadcast %cst_11 : f32 to vector<16x1xf32>
    %20 = arith.divf %18, %19 : vector<16x1xf32>
    %21 = vector.broadcast %20 : vector<16x1xf32> to vector<16x32xf32>
    %22 = arith.subf %0, %21 : vector<16x32xf32>
    %23 = arith.mulf %22, %22 : vector<16x32xf32>
    %cst_12 = arith.constant dense<0.000000e+00> : vector<16xf32>
    %24 = vector.multi_reduction <add>, %23, %cst_12 [1] : vector<16x32xf32> to vector<16xf32>
    %25 = vector.shape_cast %24 : vector<16xf32> to vector<16x1xf32>
    %cst_13 = arith.constant 3.200000e+01 : f32
    %26 = vector.broadcast %cst_13 : f32 to vector<16x1xf32>
    %27 = arith.divf %25, %26 : vector<16x1xf32>
    %cst_14 = arith.constant 9.99999974E-6 : f32
    %28 = vector.broadcast %cst_14 : f32 to vector<16x1xf32>
    %29 = arith.addf %27, %28 : vector<16x1xf32>
    %30 = math.rsqrt %29 : vector<16x1xf32>
    %31 = vector.broadcast %30 : vector<16x1xf32> to vector<16x32xf32>
    %32 = arith.mulf %22, %31 : vector<16x32xf32>
    %33 = vector.broadcast %15 : vector<1x32xf32> to vector<16x32xf32>
    %34 = arith.mulf %32, %33 : vector<16x32xf32>
    %35 = vector.broadcast %16 : vector<1x32xf32> to vector<16x32xf32>
    %36 = arith.addf %34, %35 : vector<16x32xf32>
    %cst_15 = arith.constant dense<0.000000e+00> : vector<16x32xf32>
    %37 = tpu.matmul %36, %2, %cst_15 {dimension_numbers = #tpu.dot_dimension_numbers<[1], [0], [0], [1], [0, 0, 1, 1], [], []>} : vector<16x32xf32>, vector<32x32xf32>, vector<16x32xf32> -> vector<16x32xf32>
    %38 = vector.broadcast %9 : vector<1x32xf32> to vector<16x32xf32>
    %39 = arith.addf %37, %38 : vector<16x32xf32>
    %cst_16 = arith.constant dense<0.000000e+00> : vector<16x32xf32>
    %40 = tpu.matmul %36, %3, %cst_16 {dimension_numbers = #tpu.dot_dimension_numbers<[1], [0], [0], [1], [0, 0, 1, 1], [], []>} : vector<16x32xf32>, vector<32x32xf32>, vector<16x32xf32> -> vector<16x32xf32>
    %41 = vector.broadcast %10 : vector<1x32xf32> to vector<16x32xf32>
    %42 = arith.addf %40, %41 : vector<16x32xf32>
    %cst_17 = arith.constant dense<0.000000e+00> : vector<16x32xf32>
    %43 = tpu.matmul %36, %4, %cst_17 {dimension_numbers = #tpu.dot_dimension_numbers<[1], [0], [0], [1], [0, 0, 1, 1], [], []>} : vector<16x32xf32>, vector<32x32xf32>, vector<16x32xf32> -> vector<16x32xf32>
    %44 = vector.broadcast %11 : vector<1x32xf32> to vector<16x32xf32>
    %45 = arith.addf %43, %44 : vector<16x32xf32>
    %46 = tpu.transpose %42, [1, 0] : vector<16x32xf32> -> vector<32x16xf32>
    %47 = vector.shape_cast %12 : vector<1x32xf32> to vector<1x32xf32>
    %48 = vector.broadcast %47 : vector<1x32xf32> to vector<16x32xf32>
    %49 = vector.extract_strided_slice %39 {offsets = [0, 0], sizes = [16, 8], strides = [1, 1]} : vector<16x32xf32> to vector<16x8xf32>
    %50 = vector.extract_strided_slice %46 {offsets = [0, 0], sizes = [8, 16], strides = [1, 1]} : vector<32x16xf32> to vector<8x16xf32>
    %cst_18 = arith.constant dense<0.000000e+00> : vector<16x16xf32>
    %51 = tpu.matmul %49, %50, %cst_18 {dimension_numbers = #tpu.dot_dimension_numbers<[1], [0], [0], [1], [0, 0, 1, 1], [], []>} : vector<16x8xf32>, vector<8x16xf32>, vector<16x16xf32> -> vector<16x16xf32>
    %52 = arith.addf %51, %1 : vector<16x16xf32>
    %cst_19 = arith.constant dense<0xFF800000> : vector<16xf32>
    %53 = vector.multi_reduction <maximumf>, %52, %cst_19 [1] : vector<16x16xf32> to vector<16xf32>
    %54 = vector.shape_cast %53 : vector<16xf32> to vector<16x1xf32>
    %55 = vector.broadcast %54 : vector<16x1xf32> to vector<16x16xf32>
    %56 = arith.subf %52, %55 : vector<16x16xf32>
    %57 = math.exp %56 : vector<16x16xf32>
    %cst_20 = arith.constant dense<0.000000e+00> : vector<16xf32>
    %58 = vector.multi_reduction <add>, %57, %cst_20 [1] : vector<16x16xf32> to vector<16xf32>
    %59 = vector.shape_cast %58 : vector<16xf32> to vector<16x1xf32>
    %60 = vector.broadcast %59 : vector<16x1xf32> to vector<16x16xf32>
    %61 = arith.divf %57, %60 : vector<16x16xf32>
    %62 = vector.extract_strided_slice %45 {offsets = [0, 0], sizes = [16, 8], strides = [1, 1]} : vector<16x32xf32> to vector<16x8xf32>
    %cst_21 = arith.constant dense<0.000000e+00> : vector<16x8xf32>
    %63 = tpu.matmul %61, %62, %cst_21 {dimension_numbers = #tpu.dot_dimension_numbers<[1], [0], [0], [1], [0, 0, 1, 1], [], []>} : vector<16x16xf32>, vector<16x8xf32>, vector<16x8xf32> -> vector<16x8xf32>
    %64 = vector.extract_strided_slice %5 {offsets = [0, 0], sizes = [8, 32], strides = [1, 1]} : vector<32x32xf32> to vector<8x32xf32>
    %cst_22 = arith.constant dense<0.000000e+00> : vector<16x32xf32>
    %65 = tpu.matmul %63, %64, %cst_22 {dimension_numbers = #tpu.dot_dimension_numbers<[1], [0], [0], [1], [0, 0, 1, 1], [], []>} : vector<16x8xf32>, vector<8x32xf32>, vector<16x32xf32> -> vector<16x32xf32>
    %66 = arith.addf %48, %65 : vector<16x32xf32>
    %67 = vector.extract_strided_slice %39 {offsets = [0, 8], sizes = [16, 8], strides = [1, 1]} : vector<16x32xf32> to vector<16x8xf32>
    %68 = vector.extract_strided_slice %46 {offsets = [8, 0], sizes = [8, 16], strides = [1, 1]} : vector<32x16xf32> to vector<8x16xf32>
    %cst_23 = arith.constant dense<0.000000e+00> : vector<16x16xf32>
    %69 = tpu.matmul %67, %68, %cst_23 {dimension_numbers = #tpu.dot_dimension_numbers<[1], [0], [0], [1], [0, 0, 1, 1], [], []>} : vector<16x8xf32>, vector<8x16xf32>, vector<16x16xf32> -> vector<16x16xf32>
    %70 = arith.addf %69, %1 : vector<16x16xf32>
    %cst_24 = arith.constant dense<0xFF800000> : vector<16xf32>
    %71 = vector.multi_reduction <maximumf>, %70, %cst_24 [1] : vector<16x16xf32> to vector<16xf32>
    %72 = vector.shape_cast %71 : vector<16xf32> to vector<16x1xf32>
    %73 = vector.broadcast %72 : vector<16x1xf32> to vector<16x16xf32>
    %74 = arith.subf %70, %73 : vector<16x16xf32>
    %75 = math.exp %74 : vector<16x16xf32>
    %cst_25 = arith.constant dense<0.000000e+00> : vector<16xf32>
    %76 = vector.multi_reduction <add>, %75, %cst_25 [1] : vector<16x16xf32> to vector<16xf32>
    %77 = vector.shape_cast %76 : vector<16xf32> to vector<16x1xf32>
    %78 = vector.broadcast %77 : vector<16x1xf32> to vector<16x16xf32>
    %79 = arith.divf %75, %78 : vector<16x16xf32>
    %80 = vector.extract_strided_slice %45 {offsets = [0, 8], sizes = [16, 8], strides = [1, 1]} : vector<16x32xf32> to vector<16x8xf32>
    %cst_26 = arith.constant dense<0.000000e+00> : vector<16x8xf32>
    %81 = tpu.matmul %79, %80, %cst_26 {dimension_numbers = #tpu.dot_dimension_numbers<[1], [0], [0], [1], [0, 0, 1, 1], [], []>} : vector<16x16xf32>, vector<16x8xf32>, vector<16x8xf32> -> vector<16x8xf32>
    %82 = vector.extract_strided_slice %5 {offsets = [8, 0], sizes = [8, 32], strides = [1, 1]} : vector<32x32xf32> to vector<8x32xf32>
    %cst_27 = arith.constant dense<0.000000e+00> : vector<16x32xf32>
    %83 = tpu.matmul %81, %82, %cst_27 {dimension_numbers = #tpu.dot_dimension_numbers<[1], [0], [0], [1], [0, 0, 1, 1], [], []>} : vector<16x8xf32>, vector<8x32xf32>, vector<16x32xf32> -> vector<16x32xf32>
    %84 = arith.addf %66, %83 : vector<16x32xf32>
    %85 = vector.extract_strided_slice %39 {offsets = [0, 16], sizes = [16, 8], strides = [1, 1]} : vector<16x32xf32> to vector<16x8xf32>
    %86 = vector.extract_strided_slice %46 {offsets = [16, 0], sizes = [8, 16], strides = [1, 1]} : vector<32x16xf32> to vector<8x16xf32>
    %cst_28 = arith.constant dense<0.000000e+00> : vector<16x16xf32>
    %87 = tpu.matmul %85, %86, %cst_28 {dimension_numbers = #tpu.dot_dimension_numbers<[1], [0], [0], [1], [0, 0, 1, 1], [], []>} : vector<16x8xf32>, vector<8x16xf32>, vector<16x16xf32> -> vector<16x16xf32>
    %88 = arith.addf %87, %1 : vector<16x16xf32>
    %cst_29 = arith.constant dense<0xFF800000> : vector<16xf32>
    %89 = vector.multi_reduction <maximumf>, %88, %cst_29 [1] : vector<16x16xf32> to vector<16xf32>
    %90 = vector.shape_cast %89 : vector<16xf32> to vector<16x1xf32>
    %91 = vector.broadcast %90 : vector<16x1xf32> to vector<16x16xf32>
    %92 = arith.subf %88, %91 : vector<16x16xf32>
    %93 = math.exp %92 : vector<16x16xf32>
    %cst_30 = arith.constant dense<0.000000e+00> : vector<16xf32>
    %94 = vector.multi_reduction <add>, %93, %cst_30 [1] : vector<16x16xf32> to vector<16xf32>
    %95 = vector.shape_cast %94 : vector<16xf32> to vector<16x1xf32>
    %96 = vector.broadcast %95 : vector<16x1xf32> to vector<16x16xf32>
    %97 = arith.divf %93, %96 : vector<16x16xf32>
    %98 = vector.extract_strided_slice %45 {offsets = [0, 16], sizes = [16, 8], strides = [1, 1]} : vector<16x32xf32> to vector<16x8xf32>
    %cst_31 = arith.constant dense<0.000000e+00> : vector<16x8xf32>
    %99 = tpu.matmul %97, %98, %cst_31 {dimension_numbers = #tpu.dot_dimension_numbers<[1], [0], [0], [1], [0, 0, 1, 1], [], []>} : vector<16x16xf32>, vector<16x8xf32>, vector<16x8xf32> -> vector<16x8xf32>
    %100 = vector.extract_strided_slice %5 {offsets = [16, 0], sizes = [8, 32], strides = [1, 1]} : vector<32x32xf32> to vector<8x32xf32>
    %cst_32 = arith.constant dense<0.000000e+00> : vector<16x32xf32>
    %101 = tpu.matmul %99, %100, %cst_32 {dimension_numbers = #tpu.dot_dimension_numbers<[1], [0], [0], [1], [0, 0, 1, 1], [], []>} : vector<16x8xf32>, vector<8x32xf32>, vector<16x32xf32> -> vector<16x32xf32>
    %102 = arith.addf %84, %101 : vector<16x32xf32>
    %103 = vector.extract_strided_slice %39 {offsets = [0, 24], sizes = [16, 8], strides = [1, 1]} : vector<16x32xf32> to vector<16x8xf32>
    %104 = vector.extract_strided_slice %46 {offsets = [24, 0], sizes = [8, 16], strides = [1, 1]} : vector<32x16xf32> to vector<8x16xf32>
    %cst_33 = arith.constant dense<0.000000e+00> : vector<16x16xf32>
    %105 = tpu.matmul %103, %104, %cst_33 {dimension_numbers = #tpu.dot_dimension_numbers<[1], [0], [0], [1], [0, 0, 1, 1], [], []>} : vector<16x8xf32>, vector<8x16xf32>, vector<16x16xf32> -> vector<16x16xf32>
    %106 = arith.addf %105, %1 : vector<16x16xf32>
    %cst_34 = arith.constant dense<0xFF800000> : vector<16xf32>
    %107 = vector.multi_reduction <maximumf>, %106, %cst_34 [1] : vector<16x16xf32> to vector<16xf32>
    %108 = vector.shape_cast %107 : vector<16xf32> to vector<16x1xf32>
    %109 = vector.broadcast %108 : vector<16x1xf32> to vector<16x16xf32>
    %110 = arith.subf %106, %109 : vector<16x16xf32>
    %111 = math.exp %110 : vector<16x16xf32>
    %cst_35 = arith.constant dense<0.000000e+00> : vector<16xf32>
    %112 = vector.multi_reduction <add>, %111, %cst_35 [1] : vector<16x16xf32> to vector<16xf32>
    %113 = vector.shape_cast %112 : vector<16xf32> to vector<16x1xf32>
    %114 = vector.broadcast %113 : vector<16x1xf32> to vector<16x16xf32>
    %115 = arith.divf %111, %114 : vector<16x16xf32>
    %116 = vector.extract_strided_slice %45 {offsets = [0, 24], sizes = [16, 8], strides = [1, 1]} : vector<16x32xf32> to vector<16x8xf32>
    %cst_36 = arith.constant dense<0.000000e+00> : vector<16x8xf32>
    %117 = tpu.matmul %115, %116, %cst_36 {dimension_numbers = #tpu.dot_dimension_numbers<[1], [0], [0], [1], [0, 0, 1, 1], [], []>} : vector<16x16xf32>, vector<16x8xf32>, vector<16x8xf32> -> vector<16x8xf32>
    %118 = vector.extract_strided_slice %5 {offsets = [24, 0], sizes = [8, 32], strides = [1, 1]} : vector<32x32xf32> to vector<8x32xf32>
    %cst_37 = arith.constant dense<0.000000e+00> : vector<16x32xf32>
    %119 = tpu.matmul %117, %118, %cst_37 {dimension_numbers = #tpu.dot_dimension_numbers<[1], [0], [0], [1], [0, 0, 1, 1], [], []>} : vector<16x8xf32>, vector<8x32xf32>, vector<16x32xf32> -> vector<16x32xf32>
    %120 = arith.addf %102, %119 : vector<16x32xf32>
    %121 = arith.addf %0, %120 : vector<16x32xf32>
    %cst_38 = arith.constant dense<0.000000e+00> : vector<16xf32>
    %122 = vector.multi_reduction <add>, %121, %cst_38 [1] : vector<16x32xf32> to vector<16xf32>
    %123 = vector.shape_cast %122 : vector<16xf32> to vector<16x1xf32>
    %cst_39 = arith.constant 3.200000e+01 : f32
    %124 = vector.broadcast %cst_39 : f32 to vector<16x1xf32>
    %125 = arith.divf %123, %124 : vector<16x1xf32>
    %126 = vector.broadcast %125 : vector<16x1xf32> to vector<16x32xf32>
    %127 = arith.subf %121, %126 : vector<16x32xf32>
    %128 = arith.mulf %127, %127 : vector<16x32xf32>
    %cst_40 = arith.constant dense<0.000000e+00> : vector<16xf32>
    %129 = vector.multi_reduction <add>, %128, %cst_40 [1] : vector<16x32xf32> to vector<16xf32>
    %130 = vector.shape_cast %129 : vector<16xf32> to vector<16x1xf32>
    %cst_41 = arith.constant 3.200000e+01 : f32
    %131 = vector.broadcast %cst_41 : f32 to vector<16x1xf32>
    %132 = arith.divf %130, %131 : vector<16x1xf32>
    %cst_42 = arith.constant 9.99999974E-6 : f32
    %133 = vector.broadcast %cst_42 : f32 to vector<16x1xf32>
    %134 = arith.addf %132, %133 : vector<16x1xf32>
    %135 = math.rsqrt %134 : vector<16x1xf32>
    %136 = vector.broadcast %135 : vector<16x1xf32> to vector<16x32xf32>
    %137 = arith.mulf %127, %136 : vector<16x32xf32>
    %138 = vector.broadcast %15 : vector<1x32xf32> to vector<16x32xf32>
    %139 = arith.mulf %137, %138 : vector<16x32xf32>
    %140 = vector.broadcast %16 : vector<1x32xf32> to vector<16x32xf32>
    %141 = arith.addf %139, %140 : vector<16x32xf32>
    %cst_43 = arith.constant dense<0.000000e+00> : vector<16x64xf32>
    %142 = tpu.matmul %141, %6, %cst_43 {dimension_numbers = #tpu.dot_dimension_numbers<[1], [0], [0], [1], [0, 0, 1, 1], [], []>} : vector<16x32xf32>, vector<32x64xf32>, vector<16x64xf32> -> vector<16x64xf32>
    %143 = vector.broadcast %13 : vector<1x64xf32> to vector<16x64xf32>
    %144 = arith.addf %142, %143 : vector<16x64xf32>
    %cst_44 = arith.constant 0.000000e+00 : f32
    %145 = vector.broadcast %cst_44 : f32 to vector<16x64xf32>
    %146 = arith.maximumf %144, %145 : vector<16x64xf32>
    %cst_45 = arith.constant dense<0.000000e+00> : vector<16x32xf32>
    %147 = tpu.matmul %146, %7, %cst_45 {dimension_numbers = #tpu.dot_dimension_numbers<[1], [0], [0], [1], [0, 0, 1, 1], [], []>} : vector<16x64xf32>, vector<64x32xf32>, vector<16x32xf32> -> vector<16x32xf32>
    %148 = vector.broadcast %14 : vector<1x32xf32> to vector<16x32xf32>
    %149 = arith.addf %147, %148 : vector<16x32xf32>
    %150 = arith.addf %141, %149 : vector<16x32xf32>
    %cst_46 = arith.constant dense<0.000000e+00> : vector<16xf32>
    %151 = vector.multi_reduction <add>, %150, %cst_46 [1] : vector<16x32xf32> to vector<16xf32>
    %152 = vector.shape_cast %151 : vector<16xf32> to vector<16x1xf32>
    %cst_47 = arith.constant 3.200000e+01 : f32
    %153 = vector.broadcast %cst_47 : f32 to vector<16x1xf32>
    %154 = arith.divf %152, %153 : vector<16x1xf32>
    %155 = vector.broadcast %154 : vector<16x1xf32> to vector<16x32xf32>
    %156 = arith.subf %150, %155 : vector<16x32xf32>
    %157 = arith.mulf %156, %156 : vector<16x32xf32>
    %cst_48 = arith.constant dense<0.000000e+00> : vector<16xf32>
    %158 = vector.multi_reduction <add>, %157, %cst_48 [1] : vector<16x32xf32> to vector<16xf32>
    %159 = vector.shape_cast %158 : vector<16xf32> to vector<16x1xf32>
    %cst_49 = arith.constant 3.200000e+01 : f32
    %160 = vector.broadcast %cst_49 : f32 to vector<16x1xf32>
    %161 = arith.divf %159, %160 : vector<16x1xf32>
    %cst_50 = arith.constant 9.99999974E-6 : f32
    %162 = vector.broadcast %cst_50 : f32 to vector<16x1xf32>
    %163 = arith.addf %161, %162 : vector<16x1xf32>
    %164 = math.rsqrt %163 : vector<16x1xf32>
    %165 = vector.broadcast %164 : vector<16x1xf32> to vector<16x32xf32>
    %166 = arith.mulf %156, %165 : vector<16x32xf32>
    %167 = vector.broadcast %15 : vector<1x32xf32> to vector<16x32xf32>
    %168 = arith.mulf %166, %167 : vector<16x32xf32>
    %169 = vector.broadcast %16 : vector<1x32xf32> to vector<16x32xf32>
    %170 = arith.addf %168, %169 : vector<16x32xf32>
    %c0_51 = arith.constant 0 : index
    %c0_52 = arith.constant 0 : index
    %171 = vector.load %arg4[%c0_51, %c0_52] : memref<16x32xf32, #tpu.memory_space<vmem>>, vector<16x32xf32>
    tpu.vector_store %arg4[%c0_51, %c0_52], %170 {strides = array<i32>} : memref<16x32xf32, #tpu.memory_space<vmem>>, vector<16x32xf32>,
    return
  }
  func.func @transform_0(%arg0: i32) -> (i32, i32) {
    %c0_i32 = arith.constant 0 : i32
    %c0_i32_0 = arith.constant 0 : i32
    %c0_i32_1 = arith.constant 0 : i32
    return %c0_i32, %c0_i32_0 : i32, i32
  }
  func.func @transform_1(%arg0: i32) -> (i32, i32) {
    %c0_i32 = arith.constant 0 : i32
    %c0_i32_0 = arith.constant 0 : i32
    %c0_i32_1 = arith.constant 0 : i32
    return %c0_i32, %c0_i32_0 : i32, i32
  }
  func.func @transform_2(%arg0: i32) -> (i32, i32) {
    %c0_i32 = arith.constant 0 : i32
    %c0_i32_0 = arith.constant 0 : i32
    %c0_i32_1 = arith.constant 0 : i32
    return %c0_i32, %c0_i32_0 : i32, i32
  }
  func.func @transform_3(%arg0: i32) -> (i32, i32) {
    %c0_i32 = arith.constant 0 : i32
    %c0_i32_0 = arith.constant 0 : i32
    %c0_i32_1 = arith.constant 0 : i32
    return %c0_i32, %c0_i32_0 : i32, i32
  }
}

</mosaic_0001>

<bundles_post_ra>
// kernel: tpu_custom_call.1
= control target key start
LH: loop header
LB: loop body
LE: loop exit
PB: predicated region body
PF: predicated region fallthrough
CT: control target
= control target key end

     0   :  { %8 = vsyncpa [#allocation3], 0  ;;  %s1503_s0 = inlined_call_operand.hbm [shape: f32[16,32], index: 0, kind: input, shape index: {}]   ;;  %s1504_s1 = inlined_call_operand.hbm [shape: f32[16,16], index: 1, kind: input, shape index: {}]   ;;  %s1505_s2 = inlined_call_operand.hbm [shape: f32[232,128], index: 2, kind: input, shape index: {}]   ;;  %s1506_s3 = inlined_call_operand.hbm [shape: f32[16,32], index: 3, kind: output, shape index: {}]  }
   0x1   :  { %9 = vsyncpa [#allocation6], 0 }
   0x2   :  { %10 = vsyncpa [#allocation4], 0  ;;  %s28_s14 = sshll.u32 %s1504_s1, 4  ;;  %s1242_s15 = smov [#allocation5]   ;;  %s29_s14 = int_to_ptr.hbm [resolvable:$true] %s28_s14 }
   0x3   :  { %s30_s16 = sshll.u32 %s1242_s15, 4  ;;  %s15_s19 = sshll.u32 %s1503_s0, 4  ;;  %s31_s16 = int_to_ptr.vmem [resolvable:$true] %s30_s16  ;;  %s16_s19 = int_to_ptr.hbm [resolvable:$true] %s15_s19 }
   0x4   :  { %s1243_s20 = smov 128   ;;  %s1244_s21 = smov 8  }
   0x5   :  { %36 = dma.hbm_to_vmem [thread:$0]  %s29_s14, 256, %s31_s16, [#allocation6], %s1243_s20, %s1243_s20, %s1244_s21  }
   0x6   :  { %s1245_s22 = smov [#allocation2]   ;;  %s41_s1 = sshll.u32 %s1505_s2, 4  ;;  %s42_s1 = int_to_ptr.hbm [resolvable:$true] %s41_s1 }
   0x7   :  { %s17_s23 = sshll.u32 %s1245_s22, 4  ;;  %s1246_s0 = smov [#allocation7]   ;;  %s18_s23 = int_to_ptr.vmem [resolvable:$true] %s17_s23 }
   0x8   :  { %23 = dma.hbm_to_vmem [thread:$0]  %s16_s19, 256, %s18_s23, [#allocation3], %s1243_s20, %s1243_s20, %s1244_s21  }
   0x9   :  { %s43_s26 = sshll.u32 %s1246_s0, 4  ;;  %s44_s26 = int_to_ptr.vmem [resolvable:$true] %s43_s26 }
   0xa   :  { %49 = dma.hbm_to_vmem [thread:$0]  %s42_s1, 3712, %s44_s26, [#allocation6], %s1243_s20, %s1243_s20, %s1244_s21  }
   0xb   :  { %1236 = dma.done.wait [#allocation3], 256  }
   0xc   :  { %1237 = vsyncadd [#allocation3], 4294967040 }
   0xd   :  { %1238 = dma.done.wait [#allocation6], 3968  }
   0xe   :  { %1239 = vsyncadd [#allocation6], 4294963328  ;;  %vm95_vm0 = vcmask 261120   ;;  %v1290_v0 = vld [vmem:[#allocation2 + $0x8] sm:$0xff]  ;;  %v1294_v2 = vld [vmem:[#allocation2] sm:$0xff]  ;;  %v1247_v4 = vmov 32.0  }
   0xf   :  { %v99_v1 = vsel %vm95_vm0, %v1290_v0, 0.0  ;;  %v96_v3 = vsel %vm95_vm0, %v1294_v2, 0.0  ;;  %1094 = vrcp.f32 %v1247_v4  ;;  %v69_v21 = vld [vmem:[#allocation7 + $0x18] sm:$0xff]  ;;  %v68_v22 = vld [vmem:[#allocation7 + $0x10] sm:$0xff]  ;;  %v67_v23 = vld [vmem:[#allocation7 + $0x8] sm:$0xff]  ;;  %s1248_s2 = smov 120  }
  0x10   :  { %100 = vadd.xlane.f32.xlu0 %v99_v1  ;;  %1065 = vmatpush.msra.mxu1 %v69_v21  ;;  %v66_v24 = vld [vmem:[#allocation7] sm:$0xff]  ;;  %v73_v25 = vld [vmem:[#allocation7 + $0x38] sm:$0xff]  ;;  %v72_v27 = vld [vmem:[#allocation7 + $0x30] sm:$0xff]  ;;  %vm232_vm8 = vcmask 64512   ;;  %vm268_vm9 = vcmask 130048   ;;  %s1249_s27 = smov 104  }
  0x11   :  { %172 = vmatpush.msra.mxu0 %v69_v21  ;;  %v77_v26 = vld [vmem:[#allocation7 + $0x58] sm:$0xff]  ;;  %v76_v28 = vld [vmem:[#allocation7 + $0x50] sm:$0xff]  ;;  %v71_v29 = vld [vmem:[#allocation7 + $0x28] sm:$0xff]  ;;  %s1250_s28 = smov 112   ;;  %s1251_s29 = smov [#allocation8]  }
  0x12   :  { %1066 = vmatpush.msra.mxu1 %v68_v22  ;;  %220 = vmatpush.msra.mxu2 %v77_v26  ;;  %v75_v30 = vld [vmem:[#allocation7 + $0x48] sm:$0xff]  ;;  %v70_v33 = vld [vmem:[#allocation7 + $0x20] sm:$0xff]  ;;  %v1364_v21 = vld [vmem:[#allocation5] sm:$0xff]  ;;  %s1007_s30 = sshll.u32 %s1251_s29, 4  ;;  %s1009_s6 = sshll.u32 %s1506_s3, 4  ;;  %s1008_s30 = int_to_ptr.vmem [resolvable:$true] %s1007_s30  ;;  %s1010_s6 = int_to_ptr.hbm [resolvable:$true] %s1009_s6 }
  0x13   :  { %173 = vmatpush.msra.mxu0 %v68_v22  ;;  %v74_v34 = vld [vmem:[#allocation7 + $0x40] sm:$0xff] }
  0x14   :  { %1067 = vmatpush.msra.mxu1 %v67_v23  ;;  %221 = vmatpush.msra.mxu2 %v76_v28  ;;  %v1312_v44 = vld [vmem:[#allocation7 + $0xe0] sm:$0xff] }
  0x15   :  { %v1095_v5 = vpop.eup %1094  ;;  %174 = vmatpush.msra.mxu0 %v67_v23  ;;  %v1315_v48 = vperm.slane %v1312_v44, 6  ;;  %v1318_v52 = vperm.slane %v1312_v44, 7  ;;  %v153_v62 = vperm.slane %v1312_v44, 0 }
  0x16   :  { %v103_v6 = vmul.f32 32.0, %v1095_v5  ;;  %vm107_vm1 = vweird.f32 %v1095_v5  ;;  %1068 = vmatpush.msra.mxu1 %v66_v24  ;;  %222 = vmatpush.msra.mxu2 %v75_v30 }
  0x17   :  { %175 = vmatpush.msra.mxu0 %v66_v24 }
  0x18   :  { %97 = vadd.xlane.f32.xlu0 %v96_v3  ;;  %v104_v7 = vsub.f32 1.0, %v103_v6  ;;  %196 = vmatpush.msrb.mxu1 %v73_v25  ;;  %v183_v6 = vperm.slane %v1312_v44, 1  ;;  %v1368_v25 = vld [vmem:[#allocation5 + $0x8] sm:$0xff] }
  0x19   :  { %223 = vmatpush.msra.mxu2 %v74_v34 }
  0x1a   :  { %v105_v8 = vmul.f32 %v1095_v5, %v104_v7  ;;  %197 = vmatpush.msrb.mxu1 %v72_v27 }
  0x1c   :  { %v106_v9 = vadd.f32 %v1095_v5, %v105_v8  ;;  %198 = vmatpush.msrb.mxu1 %v71_v29 }
  0x1e   :  { %v1298_v10 = vsel %vm107_vm1, %v1095_v5, %v106_v9  ;;  %199 = vmatpush.msrb.mxu1 %v70_v33 }
  0x83   :  { %v101_v11 = vpop.xlane.xlu0 %100 }
  0x84   :  { %v110_v12 = vmul.f32 %v1298_v10, %v101_v11  ;;  %v207_v11 = vperm.slane %v1312_v44, 2 }
  0x86   :  { %v112_v13 = vsub.f32 %v1290_v0, %v110_v12 }
  0x88   :  { %v114_v14 = vmul.f32 %v112_v13, %v112_v13 }
  0x8a   :  { %v118_v15 = vsel %vm95_vm0, %v114_v14, 0.0 }
  0x8b   :  { %119 = vadd.xlane.f32.xlu1 %v118_v15  ;;  %v98_v16 = vpop.xlane.xlu0 %97 }
  0x8c   :  { %v109_v17 = vmul.f32 %v1298_v10, %v98_v16 }
  0x8e   :  { %v1305_v18 = vsub.f32 %v1294_v2, %v109_v17 }
  0x90   :  { %v113_v19 = vmul.f32 %v1305_v18, %v1305_v18 }
  0x92   :  { %v115_v20 = vsel %vm95_vm0, %v113_v19, 0.0 }
  0x93   :  { %116 = vadd.xlane.f32.xlu1 %v115_v20 }
  0xfe   :  { %v120_v31 = vpop.xlane.xlu1 %119 }
  0xff   :  { %v122_v32 = vmul.f32 %v120_v31, %v1298_v10 }
 0x101   :  { %v124_v35 = vadd.f32 1e-05, %v122_v32 }
 0x103   :  { %1096 = vrsqrt.f32 %v124_v35  ;;  %vm141_vm3 = vweird.f32 %v124_v35 }
 0x106   :  { %v117_v36 = vpop.xlane.xlu1 %116 }
 0x107   :  { %v121_v37 = vmul.f32 %v117_v36, %v1298_v10 }
 0x109   :  { %v1097_v38 = vpop.eup %1096  ;;  %v123_v39 = vadd.f32 1e-05, %v121_v37 }
 0x10a   :  { %v136_v40 = vmul.f32 %v1097_v38, %v124_v35  ;;  %vm142_vm2 = vweird.f32 %v1097_v38 }
 0x10b   :  { %1098 = vrsqrt.f32 %v123_v39  ;;  %vm143_vm4 = vmor %vm141_vm3, %vm142_vm2  ;;  %vm131_vm6 = vweird.f32 %v123_v39 }
 0x10c   :  { %v137_v41 = vmul.f32 %v1097_v38, %v136_v40 }
 0x10e   :  { %v138_v42 = vmul.f32 0.5, %v137_v41 }
 0x110   :  { %v139_v43 = vsub.f32 1.5, %v138_v42 }
 0x111   :  { %v1099_v45 = vpop.eup %1098 }
 0x112   :  { %v140_v46 = vmul.f32 %v1097_v38, %v139_v43  ;;  %v126_v47 = vmul.f32 %v1099_v45, %v123_v39  ;;  %vm132_vm5 = vweird.f32 %v1099_v45 }
 0x113   :  { %vm133_vm7 = vmor %vm131_vm6, %vm132_vm5 }
 0x114   :  { %v144_v49 = vsel %vm143_vm4, %v1097_v38, %v140_v46  ;;  %v127_v50 = vmul.f32 %v1099_v45, %v126_v47 }
 0x115   :  { %v146_v51 = vmul.f32 %v144_v49, %v112_v13 }
 0x116   :  { %v128_v53 = vmul.f32 0.5, %v127_v50 }
 0x117   :  { %v149_v54 = vmul.f32 %v1315_v48, %v146_v51 }
 0x118   :  { %v129_v55 = vsub.f32 1.5, %v128_v53 }
 0x119   :  { %v152_v56 = vadd.f32 %v1318_v52, %v149_v54 }
 0x11a   :  { %v130_v57 = vmul.f32 %v1099_v45, %v129_v55 }
 0x11b   :  { %1024 = vmatmul.msk.f32.vlgmr.msra.gmra.mxu1 %vm95_vm0, %v152_v56 }
 0x11c   :  { %v134_v58 = vsel %vm133_vm7, %v1099_v45, %v130_v57 }
 0x11d   :  { %v145_v59 = vmul.f32 %v134_v58, %v1305_v18 }
 0x11f   :  { %v148_v60 = vmul.f32 %v1315_v48, %v145_v59  ;;  %v79_v59 = vld [vmem:[#allocation7 + $0x68] sm:$0xff] }
 0x121   :  { %v151_v61 = vadd.f32 %v1318_v52, %v148_v60 }
 0x123   :  { %1023 = vmatmul.msk.f32.vlgmr.msra.gmra.mxu0 %vm95_vm0, %v151_v61  ;;  %1025 = vmatmul.msk.f32.vlgmr.msrb.gmra.mxu1 %vm95_vm0, %v151_v61 }
 0x124   :  { %1027 = vmatmul.msk.f32.vlgmr.msra.gmra.mxu2 %vm95_vm0, %v151_v61 }
 0x12b   :  { %1026 = vmatmul.msk.f32.gmra.mxu1 %vm95_vm0, %v152_v56 }
 0x12c   :  { %1028 = vmatmul.msk.f32.gmra.mxu2 %vm95_vm0, %v152_v56 }
 0x198   :  { %v180_v63 = vpop.f32.mrf.mxu1 }
 0x199   :  { %v1332_v1 = vadd.f32 %v180_v63, %v153_v62 }
 0x19b   :  { %379 = vrot.lane.b32.xlu1 %v1332_v1, %s1248_s2 }
 0x1a0   :  { %v177_v3 = vpop.f32.mrf.mxu0  ;;  %v201_v4 = vpop.f32.mrf.mxu1 }
 0x1a1   :  { %v1336_v5 = vadd.f32 %v177_v3, %v153_v62  ;;  %v1348_v12 = vadd.f32 %v201_v4, %v183_v6  ;;  %v78_v62 = vld [vmem:[#allocation7 + $0x60] sm:$0xff] }
 0x1a2   :  { %367 = vmatpush.msra.mxu1 %v78_v62 }
 0x1a3   :  { %377 = vrot.lane.b32.xlu0 %v1336_v5, %s1248_s2 }
 0x1a7   :  { %v225_v7 = vpop.f32.mrf.mxu2 }
 0x1a8   :  { %v204_v8 = vpop.f32.mrf.mxu1  ;;  %v226_v14 = vadd.f32 %v225_v7, %v207_v11 }
 0x1a9   :  { %v1341_v9 = vadd.f32 %v204_v8, %v183_v6 }
 0x1ab   :  { %383 = vrot.lane.b32.xlu2 %v1341_v9, %s1248_s2  ;;  %1029 = vmatpush.xpose.msk.msra.mxu3 %vm232_vm8, %v1341_v9 }
 0x1af   :  { %v228_v13 = vpop.f32.mrf.mxu2  ;;  %1030 = vmatpush.xpose.msk.msra.mxu3 %vm232_vm8, %v1348_v12 }
 0x1b0   :  { %v229_v15 = vadd.f32 %v228_v13, %v207_v11 }
 0x1b2   :  { %337 = vmatpush.msrb.mxu0 %v229_v15  ;;  %1031 = vmatmul.msk.f32.vlgmr.msra.gmra.mxu3 %vm232_vm8, %v1336_v5  ;;  %v1354_v16 = vpack.i.bf16 %v226_v14, %v229_v15 }
 0x1b3   :  { %381 = vrot.lane.b32.xlu2 %v1348_v12, %s1248_s2 }
 0x1b4   :  { %338 = vmatpush.msrb.mxu0 %v226_v14 }
 0x1b6   :  { %522 = vmatpush.msra.mxu0 %v79_v59 }
 0x1ba   :  { %1032 = vmatmul.msk.f32.gmra.mxu3 %vm232_vm8, %v1332_v1 }
 0x205   :  { %v384_v17 = vpop.permute.xlu2 %383 }
 0x206   :  { %1037 = vmatpush.xpose.msk.msrb.mxu2 %vm232_vm8, %v384_v17 }
 0x20d   :  { %v382_v18 = vpop.permute.xlu2 %381  ;;  %v380_v20 = vpop.permute.xlu1 %379 }
 0x20e   :  { %1038 = vmatpush.xpose.msk.msrb.mxu2 %vm232_vm8, %v382_v18 }
 0x215   :  { %v378_v19 = vpop.permute.xlu0 %377 }
 0x216   :  { %1039 = vmatmul.msk.f32.vlgmr.msrb.gmra.mxu2 %vm232_vm8, %v378_v19 }
 0x21e   :  { %1040 = vmatmul.msk.f32.gmra.mxu2 %vm232_vm8, %v380_v20 }
 0x235   :  { %v262_v22 = vpop.f32.mrf.mxu3 }
 0x236   :  { %v263_v23 = vadd.f32 %v262_v22, %v1364_v21 }
 0x238   :  { %v269_v24 = vsel %vm268_vm9, %v263_v23, -inf }
 0x239   :  { %270 = vmax.xlane.f32.xlu2 %v269_v24 }
 0x23d   :  { %v265_v26 = vpop.f32.mrf.mxu3 }
 0x23e   :  { %v266_v27 = vadd.f32 %v265_v26, %v1368_v25 }
 0x240   :  { %v272_v28 = vsel %vm268_vm9, %v266_v27, -inf }
 0x241   :  { %273 = vmax.xlane.f32.xlu1 %v272_v28 }
 0x25a   :  { %1080 = vrot.lane.b32.xlu1 %v1354_v16, %s1248_s2 }
 0x262   :  { %691 = vrot.lane.b32.xlu1 %v1341_v9, %s1249_s27 }
 0x26a   :  { %685 = vrot.lane.b32.xlu1 %v1336_v5, %s1249_s27 }
 0x299   :  { %v410_v29 = vpop.f32.mrf.mxu2 }
 0x29a   :  { %v411_v30 = vadd.f32 %v410_v29, %v1364_v21 }
 0x29c   :  { %v416_v31 = vsel %vm268_vm9, %v411_v30, -inf }
 0x29d   :  { %417 = vmax.xlane.f32.xlu0 %v416_v31 }
 0x2a1   :  { %v413_v32 = vpop.f32.mrf.mxu2 }
 0x2a2   :  { %v414_v33 = vadd.f32 %v413_v32, %v1368_v25 }
 0x2a4   :  { %v419_v34 = vsel %vm268_vm9, %v414_v33, -inf }
 0x2a5   :  { %420 = vmax.xlane.f32.xlu2 %v419_v34 }
 0x2ac   :  { %v271_v35 = vpop.xlane.xlu2 %270 }
 0x2ad   :  { %v275_v36 = vsub.f32 %v263_v23, %v271_v35 }
 0x2af   :  { %v277_v37 = vmul.f32 1.442695, %v275_v36 }
 0x2b1   :  { %1100 = vpow2.f32 %v277_v37 }
 0x2b4   :  { %v274_v38 = vpop.xlane.xlu1 %273 }
 0x2b5   :  { %v276_v39 = vsub.f32 %v266_v27, %v274_v38 }
 0x2b7   :  { %v1101_v40 = vpop.eup %1100  ;;  %v279_v41 = vmul.f32 1.442695, %v276_v39 }
 0x2b8   :  { %v281_v42 = vsel %vm268_vm9, %v1101_v40, 0.0 }
 0x2b9   :  { %1102 = vpow2.f32 %v279_v41  ;;  %282 = vadd.xlane.f32.xlu2 %v281_v42 }
 0x2bf   :  { %v1383_v43 = vpop.eup %1102 }
 0x2c0   :  { %v284_v45 = vsel %vm268_vm9, %v1383_v43, 0.0 }
 0x2c1   :  { %285 = vadd.xlane.f32.xlu0 %v284_v45 }
 0x2cc   :  { %v1081_v46 = vpop.permute.xlu1 %1080 }
 0x2cd   :  { %v1082_v47 = vunpack.i.l.bf16 %v1081_v46  ;;  %v1083_v49 = vunpack.i.h.bf16 %v1081_v46 }
 0x2cf   :  { %492 = vmatpush.msrb.mxu3 %v1082_v47 }
 0x2d1   :  { %493 = vmatpush.msrb.mxu3 %v1083_v49 }
 0x2d4   :  { %v692_v23 = vpop.permute.xlu1 %691 }
 0x2d5   :  { %538 = vrot.lane.b32.xlu0 %v1341_v9, %s1250_s28 }
 0x2dd   :  { %532 = vrot.lane.b32.xlu0 %v1336_v5, %s1250_s28 }
 0x2e5   :  { %534 = vrot.lane.b32.xlu0 %v1332_v1, %s1250_s28 }
 0x310   :  { %v418_v50 = vpop.xlane.xlu0 %417 }
 0x311   :  { %v422_v51 = vsub.f32 %v411_v30, %v418_v50 }
 0x313   :  { %v424_v53 = vmul.f32 1.442695, %v422_v51 }
 0x315   :  { %1104 = vpow2.f32 %v424_v53 }
 0x318   :  { %v421_v54 = vpop.xlane.xlu2 %420 }
 0x319   :  { %v423_v55 = vsub.f32 %v414_v33, %v421_v54 }
 0x31b   :  { %v1393_v56 = vpop.eup %1104  ;;  %v426_v57 = vmul.f32 1.442695, %v423_v55 }
 0x31c   :  { %v428_v58 = vsel %vm268_vm9, %v1393_v56, 0.0 }
 0x31d   :  { %1106 = vpow2.f32 %v426_v57  ;;  %429 = vadd.xlane.f32.xlu2 %v428_v58 }
 0x323   :  { %v1397_v60 = vpop.eup %1106 }
 0x324   :  { %v431_v61 = vsel %vm268_vm9, %v1397_v60, 0.0 }
 0x325   :  { %432 = vadd.xlane.f32.xlu2 %v431_v61 }
 0x32c   :  { %v283_v63 = vpop.xlane.xlu2 %282 }
 0x32d   :  { %1108 = vrcp.f32 %v283_v63  ;;  %v298_v7 = vand.u32 2147483648, %v283_v63  ;;  %v296_v9 = vand.u32 2147483647, %v283_v63  ;;  %vm292_vm11 = vweird.f32 %v283_v63 }
 0x32f   :  { %v299_v14 = vor.u32 1.1754944e-38, %v298_v7  ;;  %vm297_vm13 = vcmp.eq.f32.partialorder %v296_v9, 8.507059e+37 }
 0x333   :  { %v1109_v3 = vpop.eup %1108 }
 0x334   :  { %v288_v4 = vmul.f32 %v1109_v3, %v283_v63  ;;  %v286_v5 = vpop.xlane.xlu0 %285  ;;  %vm293_vm10 = vweird.f32 %v1109_v3 }
 0x335   :  { %1110 = vrcp.f32 %v286_v5  ;;  %vm294_vm12 = vmor %vm292_vm11, %vm293_vm10  ;;  %v313_v22 = vand.u32 2147483648, %v286_v5  ;;  %v311_v26 = vand.u32 2147483647, %v286_v5  ;;  %vm307_vm15 = vweird.f32 %v286_v5 }
 0x336   :  { %v289_v6 = vsub.f32 1.0, %v288_v4 }
 0x337   :  { %v314_v28 = vor.u32 1.1754944e-38, %v313_v22  ;;  %vm312_vm2 = vcmp.eq.f32.partialorder %v311_v26, 8.507059e+37 }
 0x338   :  { %v290_v8 = vmul.f32 %v1109_v3, %v289_v6 }
 0x33a   :  { %v291_v11 = vadd.f32 %v1109_v3, %v290_v8 }
 0x33b   :  { %v1111_v13 = vpop.eup %1110 }
 0x33c   :  { %v303_v15 = vmul.f32 %v1111_v13, %v286_v5  ;;  %v295_v17 = vsel %vm294_vm12, %v1109_v3, %v291_v11  ;;  %vm308_vm14 = vweird.f32 %v1111_v13 }
 0x33d   :  { %536 = vrot.lane.b32.xlu2 %v1348_v12, %s1250_s28  ;;  %v300_v18 = vsel %vm297_vm13, %v299_v14, %v295_v17  ;;  %vm309_vm1 = vmor %vm307_vm15, %vm308_vm14 }
 0x33e   :  { %v304_v19 = vsub.f32 1.0, %v303_v15  ;;  %v301_v20 = vmul.f32 %v1101_v40, %v300_v18  ;;  %v231_v18 = vperm.slane %v1312_v44, 3 }
 0x340   :  { %v305_v24 = vmul.f32 %v1111_v13, %v304_v19  ;;  %1033 = vmatmul.msk.f32.vlgmr.msrb.gmra.mxu0 %vm268_vm9, %v301_v20 }
 0x341   :  { %1053 = vmatpush.xpose.msk.msrb.mxu0 %vm232_vm8, %v692_v23 }
 0x342   :  { %v306_v27 = vadd.f32 %v1111_v13, %v305_v24 }
 0x344   :  { %v310_v29 = vsel %vm309_vm1, %v1111_v13, %v306_v27 }
 0x345   :  { %689 = vrot.lane.b32.xlu2 %v1348_v12, %s1249_s27  ;;  %v315_v30 = vsel %vm312_vm2, %v314_v28, %v310_v29 }
 0x346   :  { %v316_v31 = vmul.f32 %v1383_v43, %v315_v30 }
 0x347   :  { %v539_v32 = vpop.permute.xlu0 %538 }
 0x348   :  { %1034 = vmatmul.msk.f32.gmra.mxu0 %vm268_vm9, %v316_v31  ;;  %1045 = vmatpush.xpose.msk.msrb.mxu1 %vm232_vm8, %v539_v32 }
 0x34d   :  { %687 = vrot.lane.b32.xlu2 %v1332_v1, %s1249_s27 }
 0x34f   :  { %v533_v63 = vpop.permute.xlu0 %532 }
 0x357   :  { %v535_v3 = vpop.permute.xlu0 %534 }
 0x390   :  { %v430_v33 = vpop.xlane.xlu2 %429 }
 0x391   :  { %1112 = vrcp.f32 %v430_v33  ;;  %v445_v38 = vand.u32 2147483648, %v430_v33  ;;  %v443_v39 = vand.u32 2147483647, %v430_v33  ;;  %vm439_vm4 = vweird.f32 %v430_v33 }
 0x393   :  { %v446_v42 = vor.u32 1.1754944e-38, %v445_v38  ;;  %vm444_vm6 = vcmp.eq.f32.partialorder %v443_v39, 8.507059e+37 }
 0x397   :  { %v1113_v34 = vpop.eup %1112 }
 0x398   :  { %v435_v35 = vmul.f32 %v1113_v34, %v430_v33  ;;  %v433_v36 = vpop.xlane.xlu2 %432  ;;  %vm440_vm3 = vweird.f32 %v1113_v34 }
 0x399   :  { %1114 = vrcp.f32 %v433_v36  ;;  %vm441_vm5 = vmor %vm439_vm4, %vm440_vm3  ;;  %v460_v50 = vand.u32 2147483648, %v433_v36  ;;  %v458_v53 = vand.u32 2147483647, %v433_v36  ;;  %vm454_vm10 = vweird.f32 %v433_v36 }
 0x39a   :  { %v436_v37 = vsub.f32 1.0, %v435_v35 }
 0x39b   :  { %v461_v55 = vor.u32 1.1754944e-38, %v460_v50  ;;  %vm459_vm12 = vcmp.eq.f32.partialorder %v458_v53, 8.507059e+37 }
 0x39c   :  { %v437_v12 = vmul.f32 %v1113_v34, %v436_v37 }
 0x39e   :  { %v438_v40 = vadd.f32 %v1113_v34, %v437_v12 }
 0x39f   :  { %v1115_v41 = vpop.eup %1114 }
 0x3a0   :  { %v450_v43 = vmul.f32 %v1115_v41, %v433_v36  ;;  %v537_v45 = vpop.permute.xlu2 %536  ;;  %v442_v1 = vsel %vm441_vm5, %v1113_v34, %v438_v40  ;;  %vm455_vm7 = vweird.f32 %v1115_v41 }
 0x3a1   :  { %1046 = vmatpush.xpose.msk.msrb.mxu1 %vm232_vm8, %v537_v45  ;;  %v447_v46 = vsel %vm444_vm6, %v446_v42, %v442_v1  ;;  %vm456_vm11 = vmor %vm454_vm10, %vm455_vm7 }
 0x3a2   :  { %v451_v47 = vsub.f32 1.0, %v450_v43  ;;  %v448_v49 = vmul.f32 %v1393_v56, %v447_v46 }
 0x3a4   :  { %v452_v51 = vmul.f32 %v1115_v41, %v451_v47  ;;  %1041 = vmatmul.msk.f32.vlgmr.msrb.gmra.mxu3 %vm268_vm9, %v448_v49 }
 0x3a6   :  { %v453_v54 = vadd.f32 %v1115_v41, %v452_v51 }
 0x3a8   :  { %v690_v57 = vpop.permute.xlu2 %689  ;;  %v457_v58 = vsel %vm456_vm11, %v1115_v41, %v453_v54 }
 0x3a9   :  { %1054 = vmatpush.xpose.msk.msrb.mxu0 %vm232_vm8, %v690_v57  ;;  %v462_v59 = vsel %vm459_vm12, %v461_v55, %v457_v58 }
 0x3aa   :  { %v463_v61 = vmul.f32 %v1397_v60, %v462_v59  ;;  %v686_v60 = vpop.permute.xlu1 %685 }
 0x3ac   :  { %1042 = vmatmul.msk.f32.gmra.mxu3 %vm268_vm9, %v463_v61 }
 0x3b0   :  { %v688_v7 = vpop.permute.xlu2 %687 }
 0x3bd   :  { %v340_v56 = vpop.f32.mrf.mxu0 }
 0x3be   :  { %1035 = vmatmul.msk.f32.vlgmr.msra.gmra.mxu1 %vm232_vm8, %v340_v56 }
 0x3c5   :  { %v343_v62 = vpop.f32.mrf.mxu0 }
 0x3c6   :  { %1036 = vmatmul.msk.f32.gmra.mxu1 %vm232_vm8, %v343_v62 }
 0x3ce   :  { %1047 = vmatmul.msk.f32.vlgmr.msrb.gmra.mxu1 %vm232_vm8, %v533_v63 }
 0x3d6   :  { %1048 = vmatmul.msk.f32.gmra.mxu1 %vm232_vm8, %v535_v3 }
 0x427   :  { %v495_v4 = vpop.f32.mrf.mxu3 }
 0x428   :  { %1043 = vmatmul.msk.f32.vlgmr.msra.gmra.mxu0 %vm232_vm8, %v495_v4 }
 0x42f   :  { %v498_v5 = vpop.f32.mrf.mxu3 }
 0x430   :  { %1044 = vmatmul.msk.f32.gmra.mxu0 %vm232_vm8, %v498_v5 }
 0x438   :  { %1055 = vmatmul.msk.f32.vlgmr.msrb.gmra.mxu0 %vm232_vm8, %v686_v60 }
 0x43b   :  { %v369_v6 = vpop.f32.mrf.mxu1 }
 0x43c   :  { %v375_v19 = vadd.f32 %v369_v6, %v231_v18 }
 0x440   :  { %1056 = vmatmul.msk.f32.gmra.mxu0 %vm232_vm8, %v688_v7 }
 0x443   :  { %v372_v8 = vpop.f32.mrf.mxu1 }
 0x444   :  { %v376_v23 = vadd.f32 %v372_v8, %v231_v18 }
 0x44b   :  { %v565_v9 = vpop.f32.mrf.mxu1 }
 0x44c   :  { %v566_v11 = vadd.f32 %v565_v9, %v1364_v21 }
 0x44e   :  { %v571_v13 = vsel %vm268_vm9, %v566_v11, -inf }
 0x44f   :  { %572 = vmax.xlane.f32.xlu0 %v571_v13 }
 0x453   :  { %v568_v14 = vpop.f32.mrf.mxu1 }
 0x454   :  { %v569_v15 = vadd.f32 %v568_v14, %v1368_v25 }
 0x456   :  { %v574_v17 = vsel %vm268_vm9, %v569_v15, -inf }
 0x457   :  { %575 = vmax.xlane.f32.xlu1 %v574_v17 }
 0x4a5   :  { %v524_v20 = vpop.f32.mrf.mxu0 }
 0x4a6   :  { %v1431_v22 = vadd.f32 %v524_v20, %v375_v19 }
 0x4ad   :  { %v527_v24 = vpop.f32.mrf.mxu0 }
 0x4ae   :  { %v1433_v26 = vadd.f32 %v527_v24, %v376_v23 }
 0x4b5   :  { %v718_v27 = vpop.f32.mrf.mxu0 }
 0x4b6   :  { %v719_v28 = vadd.f32 %v718_v27, %v1364_v21 }
 0x4b8   :  { %v724_v29 = vsel %vm268_vm9, %v719_v28, -inf }
 0x4b9   :  { %725 = vmax.xlane.f32.xlu2 %v724_v29 }
 0x4bd   :  { %v721_v30 = vpop.f32.mrf.mxu0 }
 0x4be   :  { %v722_v31 = vadd.f32 %v721_v30, %v1368_v25 }
 0x4c0   :  { %v727_v32 = vsel %vm268_vm9, %v722_v31, -inf }
 0x4c1   :  { %728 = vmax.xlane.f32.xlu0 %v727_v32 }
 0x4c2   :  { %v573_v33 = vpop.xlane.xlu0 %572 }
 0x4c3   :  { %v577_v34 = vsub.f32 %v566_v11, %v573_v33 }
 0x4c5   :  { %v579_v35 = vmul.f32 1.442695, %v577_v34  ;;  %v80_v34 = vld [vmem:[#allocation7 + $0x70] sm:$0xff] }
 0x4c6   :  { %675 = vmatpush.msra.mxu3 %v80_v34  ;;  %v89_v34 = vld [vmem:[#allocation7 + $0xb8] sm:$0xff] }
 0x4c7   :  { %1116 = vpow2.f32 %v579_v35 }
 0x4ca   :  { %v576_v36 = vpop.xlane.xlu1 %575 }
 0x4cb   :  { %v578_v37 = vsub.f32 %v569_v15, %v576_v36 }
 0x4cd   :  { %v1117_v38 = vpop.eup %1116  ;;  %v581_v12 = vmul.f32 1.442695, %v578_v37 }
 0x4ce   :  { %v583_v39 = vsel %vm268_vm9, %v1117_v38, 0.0 }
 0x4cf   :  { %1118 = vpow2.f32 %v581_v12  ;;  %584 = vadd.xlane.f32.xlu1 %v583_v39 }
 0x4d5   :  { %v1119_v21 = vpop.eup %1118 }
 0x4d6   :  { %v586_v40 = vsel %vm268_vm9, %v1119_v21, 0.0 }
 0x4d7   :  { %587 = vadd.xlane.f32.xlu2 %v586_v40 }
 0x4ef   :  { %1085 = vrot.lane.b32.xlu2 %v1354_v16, %s1250_s28 }
 0x52c   :  { %v726_v25 = vpop.xlane.xlu2 %725 }
 0x52d   :  { %v730_v41 = vsub.f32 %v719_v28, %v726_v25 }
 0x52f   :  { %v732_v42 = vmul.f32 1.442695, %v730_v41 }
 0x531   :  { %1120 = vpow2.f32 %v732_v42 }
 0x534   :  { %v729_v43 = vpop.xlane.xlu0 %728 }
 0x535   :  { %v731_v45 = vsub.f32 %v722_v31, %v729_v43 }
 0x537   :  { %v1443_v1 = vpop.eup %1120  ;;  %v734_v46 = vmul.f32 1.442695, %v731_v45 }
 0x538   :  { %v736_v47 = vsel %vm268_vm9, %v1443_v1, 0.0 }
 0x539   :  { %1122 = vpow2.f32 %v734_v46  ;;  %737 = vadd.xlane.f32.xlu0 %v736_v47  ;;  %v81_v46 = vld [vmem:[#allocation7 + $0x78] sm:$0xff] }
 0x53f   :  { %v1447_v49 = vpop.eup %1122 }
 0x540   :  { %v739_v50 = vsel %vm268_vm9, %v1447_v49, 0.0 }
 0x541   :  { %740 = vadd.xlane.f32.xlu1 %v739_v50 }
 0x542   :  { %v585_v51 = vpop.xlane.xlu1 %584 }
 0x543   :  { %1124 = vrcp.f32 %v585_v51  ;;  %v600_v58 = vand.u32 2147483648, %v585_v51  ;;  %v598_v61 = vand.u32 2147483647, %v585_v51  ;;  %vm594_vm14 = vweird.f32 %v585_v51 }
 0x545   :  { %v601_v63 = vor.u32 1.1754944e-38, %v600_v58  ;;  %vm599_vm1 = vcmp.eq.f32.partialorder %v598_v61, 8.507059e+37 }
 0x549   :  { %v1125_v53 = vpop.eup %1124 }
 0x54a   :  { %v590_v54 = vmul.f32 %v1125_v53, %v585_v51  ;;  %v588_v55 = vpop.xlane.xlu2 %587  ;;  %vm595_vm13 = vweird.f32 %v1125_v53 }
 0x54b   :  { %1126 = vrcp.f32 %v588_v55  ;;  %vm596_vm15 = vmor %vm594_vm14, %vm595_vm13  ;;  %v615_v8 = vand.u32 2147483648, %v588_v55  ;;  %v613_v13 = vand.u32 2147483647, %v588_v55  ;;  %vm609_vm3 = vweird.f32 %v588_v55 }
 0x54c   :  { %v591_v57 = vsub.f32 1.0, %v590_v54 }
 0x54d   :  { %1090 = vrot.lane.b32.xlu0 %v1354_v16, %s1249_s27  ;;  %v616_v15 = vor.u32 1.1754944e-38, %v615_v8  ;;  %vm614_vm5 = vcmp.eq.f32.partialorder %v613_v13, 8.507059e+37 }
 0x54e   :  { %v592_v59 = vmul.f32 %v1125_v53, %v591_v57 }
 0x550   :  { %v593_v56 = vadd.f32 %v1125_v53, %v592_v59 }
 0x551   :  { %v1127_v62 = vpop.eup %1126 }
 0x552   :  { %v597_v3 = vsel %vm596_vm15, %v1125_v53, %v593_v56  ;;  %v605_v4 = vmul.f32 %v1127_v62, %v588_v55  ;;  %v1086_v5 = vpop.permute.xlu2 %1085  ;;  %vm610_vm2 = vweird.f32 %v1127_v62 }
 0x553   :  { %v602_v60 = vsel %vm599_vm1, %v601_v63, %v597_v3  ;;  %v1087_v6 = vunpack.i.l.bf16 %v1086_v5  ;;  %v1088_v9 = vunpack.i.h.bf16 %v1086_v5  ;;  %vm611_vm4 = vmor %vm609_vm3, %vm610_vm2 }
 0x554   :  { %v606_v7 = vsub.f32 1.0, %v605_v4  ;;  %v603_v16 = vmul.f32 %v1117_v38, %v602_v60 }
 0x555   :  { %645 = vmatpush.msra.mxu2 %v1087_v6 }
 0x556   :  { %v607_v11 = vmul.f32 %v1127_v62, %v606_v7 }
 0x557   :  { %646 = vmatpush.msra.mxu2 %v1088_v9 }
 0x558   :  { %1049 = vmatmul.msk.f32.vlgmr.msra.gmra.mxu2 %vm268_vm9, %v603_v16  ;;  %v608_v14 = vadd.f32 %v1127_v62, %v607_v11 }
 0x559   :  { %828 = vmatpush.msrb.mxu2 %v81_v46 }
 0x55a   :  { %v612_v17 = vsel %vm611_vm4, %v1127_v62, %v608_v14 }
 0x55b   :  { %v617_v18 = vsel %vm614_vm5, %v616_v15, %v612_v17  ;;  %v84_v15 = vld [vmem:[#allocation7 + $0x90] sm:$0xff]  ;;  %v83_v17 = vld [vmem:[#allocation7 + $0x88] sm:$0xff]  ;;  %vm921_vm5 = vcmask 523264  }
 0x55c   :  { %v618_v19 = vmul.f32 %v1119_v21, %v617_v18  ;;  %v82_v18 = vld [vmem:[#allocation7 + $0x80] sm:$0xff] }
 0x560   :  { %1050 = vmatmul.msk.f32.gmra.mxu2 %vm268_vm9, %v618_v19 }
 0x5ac   :  { %v738_v20 = vpop.xlane.xlu0 %737 }
 0x5ad   :  { %1128 = vrcp.f32 %v738_v20  ;;  %v753_v31 = vand.u32 2147483648, %v738_v20  ;;  %vm747_vm7 = vweird.f32 %v738_v20  ;;  %v751_v33 = vand.u32 2147483647, %v738_v20 }
 0x5af   :  { %v754_v37 = vor.u32 1.1754944e-38, %v753_v31  ;;  %vm752_vm11 = vcmp.eq.f32.partialorder %v751_v33, 8.507059e+37  ;;  %v90_v31 = vld [vmem:[#allocation7 + $0xc0] sm:$0xff] }
 0x5b3   :  { %v1129_v23 = vpop.eup %1128 }
 0x5b4   :  { %v743_v24 = vmul.f32 %v1129_v23, %v738_v20  ;;  %v741_v27 = vpop.xlane.xlu1 %740  ;;  %vm748_vm6 = vweird.f32 %v1129_v23 }
 0x5b5   :  { %1130 = vrcp.f32 %v741_v27  ;;  %vm749_vm10 = vmor %vm747_vm7, %vm748_vm6  ;;  %v768_v25 = vand.u32 2147483648, %v741_v27  ;;  %vm762_vm13 = vweird.f32 %v741_v27  ;;  %v766_v45 = vand.u32 2147483647, %v741_v27 }
 0x5b6   :  { %v744_v28 = vsub.f32 1.0, %v743_v24  ;;  %v93_v24 = vld [vmem:[#allocation7 + $0xd8] sm:$0xff] }
 0x5b7   :  { %v769_v50 = vor.u32 1.1754944e-38, %v768_v25  ;;  %vm767_vm15 = vcmp.eq.f32.partialorder %v766_v45, 8.507059e+37  ;;  %936 = vmatpush.msra.mxu0 %v93_v24 }
 0x5b8   :  { %v745_v29 = vmul.f32 %v1129_v23, %v744_v28  ;;  %v91_v28 = vld [vmem:[#allocation7 + $0xc8] sm:$0xff] }
 0x5ba   :  { %v746_v30 = vadd.f32 %v1129_v23, %v745_v29 }
 0x5bb   :  { %v1131_v32 = vpop.eup %1130 }
 0x5bc   :  { %v758_v35 = vmul.f32 %v1131_v32, %v741_v27  ;;  %v750_v36 = vsel %vm749_vm10, %v1129_v23, %v746_v30  ;;  %vm763_vm12 = vweird.f32 %v1131_v32  ;;  %v92_v27 = vld [vmem:[#allocation7 + $0xd0] sm:$0xff] }
 0x5bd   :  { %v755_v39 = vsel %vm752_vm11, %v754_v37, %v750_v36  ;;  %vm764_vm14 = vmor %vm762_vm13, %vm763_vm12  ;;  %937 = vmatpush.msra.mxu0 %v92_v27 }
 0x5be   :  { %v759_v38 = vsub.f32 1.0, %v758_v35  ;;  %v756_v43 = vmul.f32 %v1443_v1, %v755_v39 }
 0x5bf   :  { %v1091_v12 = vpop.permute.xlu0 %1090  ;;  %938 = vmatpush.msra.mxu0 %v91_v28 }
 0x5c0   :  { %v760_v21 = vmul.f32 %v1131_v32, %v759_v38  ;;  %v1092_v40 = vunpack.i.l.bf16 %v1091_v12  ;;  %v1093_v41 = vunpack.i.h.bf16 %v1091_v12 }
 0x5c1   :  { %939 = vmatpush.msra.mxu0 %v90_v31 }
 0x5c2   :  { %798 = vmatpush.msra.mxu1 %v1092_v40  ;;  %v761_v42 = vadd.f32 %v1131_v32, %v760_v21 }
 0x5c3   :  { %940 = vmatpush.msra.mxu0 %v89_v34 }
 0x5c4   :  { %799 = vmatpush.msra.mxu1 %v1093_v41  ;;  %v765_v47 = vsel %vm764_vm14, %v1131_v32, %v761_v42 }
 0x5c5   :  { %1057 = vmatmul.msk.f32.vlgmr.msra.gmra.mxu1 %vm268_vm9, %v756_v43  ;;  %v770_v51 = vsel %vm767_vm15, %v769_v50, %v765_v47 }
 0x5c6   :  { %v771_v53 = vmul.f32 %v1447_v49, %v770_v51 }
 0x5cd   :  { %1058 = vmatmul.msk.f32.gmra.mxu1 %vm268_vm9, %v771_v53 }
 0x5db   :  { %v648_v54 = vpop.f32.mrf.mxu2 }
 0x5dc   :  { %1051 = vmatmul.msk.f32.vlgmr.msra.gmra.mxu3 %vm232_vm8, %v648_v54 }
 0x5e3   :  { %v651_v55 = vpop.f32.mrf.mxu2 }
 0x5e4   :  { %1052 = vmatmul.msk.f32.gmra.mxu3 %vm232_vm8, %v651_v55  ;;  %v88_v55 = vld [vmem:[#allocation7 + $0xb0] sm:$0xff] }
 0x5e5   :  { %941 = vmatpush.msra.mxu0 %v88_v55 }
 0x642   :  { %v801_v1 = vpop.f32.mrf.mxu1 }
 0x643   :  { %1059 = vmatmul.msk.f32.vlgmr.msrb.gmra.mxu2 %vm232_vm8, %v801_v1  ;;  %v87_v1 = vld [vmem:[#allocation7 + $0xa8] sm:$0xff] }
 0x644   :  { %942 = vmatpush.msra.mxu0 %v87_v1 }
 0x64a   :  { %v804_v57 = vpop.f32.mrf.mxu1 }
 0x64b   :  { %1060 = vmatmul.msk.f32.gmra.mxu2 %vm232_vm8, %v804_v57  ;;  %v86_v57 = vld [vmem:[#allocation7 + $0xa0] sm:$0xff] }
 0x64c   :  { %943 = vmatpush.msra.mxu0 %v86_v57 }
 0x65f   :  { %v677_v58 = vpop.f32.mrf.mxu3 }
 0x660   :  { %v683_v59 = vadd.f32 %v677_v58, %v1431_v22  ;;  %v888_v58 = vperm.slane %v1312_v44, 4 }
 0x667   :  { %v680_v62 = vpop.f32.mrf.mxu3 }
 0x668   :  { %v684_v3 = vadd.f32 %v680_v62, %v1433_v26 }
 0x6c6   :  { %v830_v61 = vpop.f32.mrf.mxu2 }
 0x6c7   :  { %v836_v56 = vadd.f32 %v830_v61, %v683_v59 }
 0x6c9   :  { %v838_v49 = vadd.f32 %v836_v56, %v1294_v2 }
 0x6cb   :  { %v840_v63 = vsel %vm95_vm0, %v838_v49, 0.0 }
 0x6cc   :  { %841 = vadd.xlane.f32.xlu1 %v840_v63 }
 0x6ce   :  { %v833_v4 = vpop.f32.mrf.mxu2 }
 0x6cf   :  { %v837_v5 = vadd.f32 %v833_v4, %v684_v3  ;;  %v920_v3 = vperm.slane %v1312_v44, 5 }
 0x6d1   :  { %v839_v60 = vadd.f32 %v837_v5, %v1290_v0  ;;  %v85_v0 = vld [vmem:[#allocation7 + $0x98] sm:$0xff] }
 0x6d2   :  { %907 = vmatpush.msrb.mxu3 %v85_v0 }
 0x6d3   :  { %v843_v6 = vsel %vm95_vm0, %v839_v60, 0.0 }
 0x6d4   :  { %844 = vadd.xlane.f32.xlu1 %v843_v6  ;;  %908 = vmatpush.msrb.mxu3 %v84_v15 }
 0x6d6   :  { %909 = vmatpush.msrb.mxu3 %v83_v17 }
 0x6d8   :  { %910 = vmatpush.msrb.mxu3 %v82_v18 }
 0x73f   :  { %v842_v7 = vpop.xlane.xlu1 %841 }
 0x740   :  { %v846_v22 = vmul.f32 %v842_v7, %v1298_v10 }
 0x742   :  { %v848_v8 = vsub.f32 %v838_v49, %v846_v22 }
 0x744   :  { %v850_v9 = vmul.f32 %v848_v8, %v848_v8 }
 0x746   :  { %v852_v2 = vsel %vm95_vm0, %v850_v9, 0.0 }
 0x747   :  { %853 = vadd.xlane.f32.xlu1 %v852_v2  ;;  %v845_v11 = vpop.xlane.xlu1 %844 }
 0x748   :  { %v847_v16 = vmul.f32 %v845_v11, %v1298_v10 }
 0x74a   :  { %v849_v13 = vsub.f32 %v839_v60, %v847_v16 }
 0x74c   :  { %v851_v26 = vmul.f32 %v849_v13, %v849_v13 }
 0x74e   :  { %v855_v14 = vsel %vm95_vm0, %v851_v26, 0.0 }
 0x74f   :  { %856 = vadd.xlane.f32.xlu0 %v855_v14 }
 0x7ba   :  { %v854_v19 = vpop.xlane.xlu1 %853 }
 0x7bb   :  { %v858_v20 = vmul.f32 %v854_v19, %v1298_v10 }
 0x7bd   :  { %v860_v23 = vadd.f32 1e-05, %v858_v20 }
 0x7bf   :  { %1132 = vrsqrt.f32 %v860_v23  ;;  %vm868_vm9 = vweird.f32 %v860_v23 }
 0x7c2   :  { %v857_v29 = vpop.xlane.xlu0 %856 }
 0x7c3   :  { %v859_v30 = vmul.f32 %v857_v29, %v1298_v10 }
 0x7c5   :  { %v1133_v32 = vpop.eup %1132  ;;  %v861_v33 = vadd.f32 1e-05, %v859_v30 }
 0x7c6   :  { %v863_v35 = vmul.f32 %v1133_v32, %v860_v23  ;;  %vm869_vm8 = vweird.f32 %v1133_v32 }
 0x7c7   :  { %1134 = vrsqrt.f32 %v861_v33  ;;  %vm870_vm1 = vmor %vm868_vm9, %vm869_vm8  ;;  %vm878_vm3 = vweird.f32 %v861_v33 }
 0x7c8   :  { %v864_v36 = vmul.f32 %v1133_v32, %v863_v35 }
 0x7ca   :  { %v865_v37 = vmul.f32 0.5, %v864_v36 }
 0x7cc   :  { %v866_v38 = vsub.f32 1.5, %v865_v37 }
 0x7cd   :  { %v1135_v12 = vpop.eup %1134 }
 0x7ce   :  { %v867_v39 = vmul.f32 %v1133_v32, %v866_v38  ;;  %v873_v21 = vmul.f32 %v1135_v12, %v861_v33  ;;  %vm879_vm2 = vweird.f32 %v1135_v12 }
 0x7cf   :  { %vm880_vm4 = vmor %vm878_vm3, %vm879_vm2 }
 0x7d0   :  { %v871_v40 = vsel %vm870_vm1, %v1133_v32, %v867_v39  ;;  %v874_v25 = vmul.f32 %v1135_v12, %v873_v21 }
 0x7d1   :  { %v882_v41 = vmul.f32 %v871_v40, %v848_v8 }
 0x7d2   :  { %v875_v42 = vmul.f32 0.5, %v874_v25 }
 0x7d3   :  { %v884_v43 = vmul.f32 %v882_v41, %v1315_v48 }
 0x7d4   :  { %v876_v45 = vsub.f32 1.5, %v875_v42 }
 0x7d5   :  { %v886_v46 = vadd.f32 %v884_v43, %v1318_v52 }
 0x7d6   :  { %v877_v47 = vmul.f32 %v1135_v12, %v876_v45 }
 0x7d7   :  { %1061 = vmatmul.msk.f32.vlgmr.msrb.gmra.mxu3 %vm95_vm0, %v886_v46 }
 0x7d8   :  { %v881_v50 = vsel %vm880_vm4, %v1135_v12, %v877_v47 }
 0x7d9   :  { %v883_v51 = vmul.f32 %v881_v50, %v849_v13 }
 0x7db   :  { %v885_v53 = vmul.f32 %v883_v51, %v1315_v48 }
 0x7dd   :  { %v887_v54 = vadd.f32 %v885_v53, %v1318_v52 }
 0x7df   :  { %1062 = vmatmul.msk.f32.gmra.mxu3 %vm95_vm0, %v887_v54 }
 0x85a   :  { %v912_v59 = vpop.f32.mrf.mxu3 }
 0x85b   :  { %v913_v61 = vadd.f32 %v912_v59, %v888_v58 }
 0x85d   :  { %v918_v56 = vmax.f32 %v913_v61, 0.0 }
 0x85f   :  { %1063 = vmatmul.msk.f32.vlgmr.msra.gmra.mxu0 %vm921_vm5, %v918_v56 }
 0x862   :  { %v915_v49 = vpop.f32.mrf.mxu3 }
 0x863   :  { %v916_v62 = vadd.f32 %v915_v49, %v888_v58 }
 0x865   :  { %v919_v63 = vmax.f32 %v916_v62, 0.0 }
 0x867   :  { %1064 = vmatmul.msk.f32.gmra.mxu0 %vm921_vm5, %v919_v63 }
 0x8dc   :  { %v945_v4 = vpop.f32.mrf.mxu0 }
 0x8dd   :  { %v946_v5 = vadd.f32 %v945_v4, %v920_v3 }
 0x8df   :  { %v951_v60 = vadd.f32 %v946_v5, %v886_v46 }
 0x8e1   :  { %v953_v6 = vsel %vm95_vm0, %v951_v60, 0.0 }
 0x8e2   :  { %954 = vadd.xlane.f32.xlu2 %v953_v6 }
 0x8e4   :  { %v948_v7 = vpop.f32.mrf.mxu0 }
 0x8e5   :  { %v949_v22 = vadd.f32 %v948_v7, %v920_v3 }
 0x8e7   :  { %v952_v8 = vadd.f32 %v949_v22, %v887_v54 }
 0x8e9   :  { %v956_v9 = vsel %vm95_vm0, %v952_v8, 0.0 }
 0x8ea   :  { %957 = vadd.xlane.f32.xlu1 %v956_v9 }
 0x955   :  { %v955_v2 = vpop.xlane.xlu2 %954 }
 0x956   :  { %v959_v11 = vmul.f32 %v955_v2, %v1298_v10 }
 0x958   :  { %v961_v16 = vsub.f32 %v951_v60, %v959_v11 }
 0x95a   :  { %v963_v13 = vmul.f32 %v961_v16, %v961_v16 }
 0x95c   :  { %v965_v26 = vsel %vm95_vm0, %v963_v13, 0.0 }
 0x95d   :  { %v958_v44 = vpop.xlane.xlu1 %957  ;;  %966 = vadd.xlane.f32.xlu1 %v965_v26 }
 0x95e   :  { %v960_v14 = vmul.f32 %v958_v44, %v1298_v10 }
 0x960   :  { %v962_v0 = vsub.f32 %v952_v8, %v960_v14 }
 0x962   :  { %v964_v15 = vmul.f32 %v962_v0, %v962_v0 }
 0x964   :  { %v968_v17 = vsel %vm95_vm0, %v964_v15, 0.0 }
 0x965   :  { %969 = vadd.xlane.f32.xlu1 %v968_v17 }
 0x9d0   :  { %v967_v18 = vpop.xlane.xlu1 %966 }
 0x9d1   :  { %v971_v19 = vmul.f32 %v967_v18, %v1298_v10 }
 0x9d3   :  { %v973_v20 = vadd.f32 1e-05, %v971_v19 }
 0x9d5   :  { %1136 = vrsqrt.f32 %v973_v20  ;;  %vm981_vm7 = vweird.f32 %v973_v20 }
 0x9d8   :  { %v970_v23 = vpop.xlane.xlu1 %969 }
 0x9d9   :  { %v972_v24 = vmul.f32 %v970_v23, %v1298_v10 }
 0x9db   :  { %v1137_v27 = vpop.eup %1136  ;;  %v974_v28 = vadd.f32 1e-05, %v972_v24 }
 0x9dc   :  { %v976_v29 = vmul.f32 %v1137_v27, %v973_v20  ;;  %vm982_vm6 = vweird.f32 %v1137_v27 }
 0x9dd   :  { %1138 = vrsqrt.f32 %v974_v28  ;;  %vm983_vm10 = vmor %vm981_vm7, %vm982_vm6  ;;  %vm991_vm12 = vweird.f32 %v974_v28 }
 0x9de   :  { %v977_v30 = vmul.f32 %v1137_v27, %v976_v29 }
 0x9e0   :  { %v978_v31 = vmul.f32 0.5, %v977_v30 }
 0x9e2   :  { %v979_v32 = vsub.f32 1.5, %v978_v31 }
 0x9e3   :  { %v1139_v33 = vpop.eup %1138 }
 0x9e4   :  { %v980_v34 = vmul.f32 %v1137_v27, %v979_v32  ;;  %v986_v35 = vmul.f32 %v1139_v33, %v974_v28  ;;  %vm992_vm11 = vweird.f32 %v1139_v33 }
 0x9e5   :  { %vm993_vm13 = vmor %vm991_vm12, %vm992_vm11 }
 0x9e6   :  { %v984_v36 = vsel %vm983_vm10, %v1137_v27, %v980_v34  ;;  %v987_v37 = vmul.f32 %v1139_v33, %v986_v35 }
 0x9e7   :  { %v995_v38 = vmul.f32 %v984_v36, %v961_v16 }
 0x9e8   :  { %v988_v12 = vmul.f32 0.5, %v987_v37 }
 0x9e9   :  { %v997_v39 = vmul.f32 %v995_v38, %v1315_v48 }
 0x9ea   :  { %v989_v10 = vsub.f32 1.5, %v988_v12 }
 0x9eb   :  { %v999_v21 = vadd.f32 %v997_v39, %v1318_v52 }
 0x9ec   :  { %v990_v40 = vmul.f32 %v1139_v33, %v989_v10 }
 0x9ed   :  { %1001 = vst.msk [vmem:[#allocation8] sm:$0xff] %vm95_vm0, %v999_v21 }
 0x9ee   :  { %v994_v25 = vsel %vm993_vm13, %v1139_v33, %v990_v40 }
 0x9ef   :  { %v996_v41 = vmul.f32 %v994_v25, %v962_v0 }
 0x9f1   :  { %v998_v42 = vmul.f32 %v996_v41, %v1315_v48 }
 0x9f3   :  { %v1000_v43 = vadd.f32 %v998_v42, %v1318_v52 }
 0x9f5   :  { %1002 = vst.msk [vmem:[#allocation8 + $0x8] sm:$0xff] %vm95_vm0, %v1000_v43 }
 0x9f6   :  { %1015 = dma.vmem_to_hbm [thread:$0]  %s1008_s30, 256, %s1010_s6, [#allocation4], %s1243_s20, %s1243_s20, %s1244_s21  }
 0x9f7   :  { %1240 = dma.done.wait [#allocation4], 256  }
 0x9f8   :  { %1241 = vsyncadd [#allocation4], 4294967040 }
 0x9f9   :  { %1020 = vsyncpa [#allocation3], 1 }
 0x9fa   :  { %1021 = vsyncpa [#allocation6], 1 }
 0x9fb   :  { %1022 = vsyncpa [#allocation4], 1 }

</bundles_post_ra>
